<compile_context>
chip_gen: v6e
topology: v6e:2x2x1
jax: 0.10.0
libtpu: 0.0.40
codegen_flags: <defaults>
</compile_context>

<pallas_src>
import functools

import jax
import jax.numpy as jnp
from jax.experimental import pallas as pl
from jax.experimental.pallas import tpu as pltpu

BN_EPS = 1e-5

_COMPILER_PARAMS = pltpu.CompilerParams(
    dimension_semantics=("parallel", "parallel"),
    vmem_limit_bytes=48 * 1024 * 1024,   # explicit, with headroom under v7x's 64 MiB
)


def _round_up(x, m):
    return ((x + m - 1) // m) * m


def _pick_tile_l(l, c_in, c_out, in_bytes, y_bytes, target=1024, budget=40 << 20):
    """L-tile: large enough to amortize ~0.35us/step, small enough for VMEM."""
    # double-buffered input + double-buffered output + f32 accumulator, per row
    per_row = 2 * c_in * in_bytes + 2 * (2 * c_out) * y_bytes + (2 * c_out) * 4
    cap = max(8, budget // max(per_row, 1))
    cap -= cap % 8
    tgt = max(8, min(target, cap))
    if l <= tgt:
        return l                              # single full-L tile
    t = tgt - (tgt % 8)
    while t >= 8:
        if l % t == 0:
            return t                          # clean divisor: no padding needed
        t -= 8
    return max(8, tgt - (tgt % 8))            # no divisor: wrapper pads + masks stats


# ---------------------------------------------------------------------------
# Single pass: folded-upsample conv (even|odd packed on lanes) + BN partial stats.
# ---------------------------------------------------------------------------
def _conv_stats_kernel(x_ref, h_ref, w_ref, y_ref, stats_ref, *, l_valid, masked):
    # x_ref:     (1, T, C_in)        bulk input rows of this tile (mxu dtype)
    # h_ref:     (1, 1, 2, C_in)     halo rows [x[i*T-1], x[(i+1)*T]] (zeros at edges)
    # w_ref:     (3, C_in, 2*C_out)  folded taps [Wa, Wb, Wc], even cols | odd cols
    # y_ref:     (1, T, 2*C_out)     conv result (store dtype)
    # stats_ref: (1, 1, 8, Cpad)     rows 0/1 = per-column sum / sum-of-squares (f32)
    t = x_ref.shape[1]
    c2 = w_ref.shape[2]

    xw = x_ref[0]                                           # (T, C_in)
    halo = h_ref[0, 0]                                      # (2, C_in)
    xfull = jnp.concatenate([halo[0:1], xw, halo[1:2]], axis=0)   # (T+2, C_in)

    # Three accumulating GEMMs into one contiguous (T, 2*C_out) f32 result.
    acc = jnp.dot(xfull[0:t], w_ref[0], preferred_element_type=jnp.float32)
    acc = acc + jnp.dot(xfull[1:t + 1], w_ref[1], preferred_element_type=jnp.float32)
    acc = acc + jnp.dot(xfull[2:t + 2], w_ref[2], preferred_element_type=jnp.float32)

    # NOTE: conv bias intentionally omitted -- training-mode BN subtracts the
    # batch mean, which cancels a per-channel constant exactly.
    y_ref[0] = acc.astype(y_ref.dtype)                      # one lane-dense store

    if masked:  # exclude wrapper-padded rows (global row >= l_valid) from BN stats
        rows = (jax.lax.broadcasted_iota(jnp.int32, (t, 1), 0)
                + pl.program_id(0) * t)
        acc = acc * (rows < l_valid).astype(jnp.float32)

    s = jnp.sum(acc, axis=0, keepdims=True)                 # (1, 2*C_out) f32
    q = jnp.sum(acc * acc, axis=0, keepdims=True)
    blk = jnp.concatenate([s, q, jnp.zeros((6, c2), jnp.float32)], axis=0)  # (8, 2*C_out)
    cpad = stats_ref.shape[3]
    if cpad > c2:
        blk = jnp.concatenate([blk, jnp.zeros((8, cpad - c2), jnp.float32)], axis=1)
    stats_ref[0, 0] = blk                                   # dense (8, 128k) store


@functools.partial(jax.jit, static_argnames=("tile_l", "mxu_dtype", "y_dtype"))
def up_conv_forward(x_ncl, weight, bias, gamma, beta, *,
                    tile_l=None, mxu_dtype=jnp.bfloat16, y_dtype=None):
    """x_ncl: (N, C_in, L) f32.  Returns (N, C_out, 2*L) f32 (PyTorch NCL)."""
    del bias  # provably cancelled by training-mode BatchNorm mean subtraction
    if y_dtype is None:
        y_dtype = mxu_dtype
    n, c_in, l = x_ncl.shape
    c_out = weight.shape[0]
    lout = 2 * l
    c2 = 2 * c_out
    in_b = jnp.dtype(mxu_dtype).itemsize
    y_b = jnp.dtype(y_dtype).itemsize

    if tile_l is None:
        tile_l = _pick_tile_l(l, c_in, c_out, in_b, y_b)
    tile_l = int(min(max(int(tile_l), 1), l))
    if tile_l < l and tile_l % 8 != 0:
        tile_l = min(_round_up(tile_l, 8), l)
    num_tiles = pl.cdiv(l, tile_l)
    lpad = num_tiles * tile_l
    masked = lpad != l

    # ---- input prep: one fused NCL -> NLC transpose + cast; NO window gather.
    x_nlc = jnp.transpose(x_ncl, (0, 2, 1)).astype(mxu_dtype)      # (N, L, C_in)
    if masked:
        x_nlc = jnp.concatenate(
            [x_nlc, jnp.zeros((n, lpad - l, c_in), mxu_dtype)], axis=1)

    # ---- tiny halo side tensor: rows x[i*T-1] and x[(i+1)*T] per tile (zeros at
    # the sequence edges == the conv's zero padding after x2 upsampling).
    x_t = x_nlc.reshape(n, num_tiles, tile_l, c_in)
    last = x_t[:, :, tile_l - 1, :]                                 # (N, nt, C_in)
    first = x_t[:, :, 0, :]                                         # (N, nt, C_in)
    zrow = jnp.zeros((n, 1, c_in), mxu_dtype)
    prev = jnp.concatenate([zrow, last[:, :num_tiles - 1, :]], axis=1)
    nxt = jnp.concatenate([first[:, 1:, :], zrow], axis=1)
    halo = jnp.transpose(jnp.stack([prev, nxt], axis=2), (1, 0, 2, 3))  # (nt,N,2,C_in)

    # ---- folded taps: upsample absorbed; even|odd outputs packed on lanes.
    w = weight.astype(jnp.float32)                                  # (C_out, C_in, 3)
    w0, w1, w2 = w[:, :, 0].T, w[:, :, 1].T, w[:, :, 2].T           # (C_in, C_out)
    zz = jnp.zeros_like(w0)
    w_all = jnp.stack([jnp.concatenate([w0, zz], axis=1),           # x[t-1] taps
                       jnp.concatenate([w1 + w2, w0 + w1], axis=1), # x[t]   taps
                       jnp.concatenate([zz, w2], axis=1)],          # x[t+1] taps
                      axis=0).astype(mxu_dtype)                     # (3, C_in, 2*C_out)

    cpad = _round_up(c2, 128)
    kernel = functools.partial(_conv_stats_kernel, l_valid=l, masked=masked)

    y_p, stats = pl.pallas_call(
        kernel,
        grid=(num_tiles, n),
        in_specs=[
            pl.BlockSpec((1, tile_l, c_in), lambda i, b: (b, i, 0)),
            pl.BlockSpec((1, 1, 2, c_in), lambda i, b: (i, b, 0, 0)),
            pl.BlockSpec((3, c_in, c2), lambda i, b: (0, 0, 0)),
        ],
        out_specs=[
            pl.BlockSpec((1, tile_l, c2), lambda i, b: (b, i, 0)),
            pl.BlockSpec((1, 1, 8, cpad), lambda i, b: (i, b, 0, 0)),
        ],
        out_shape=[
            jax.ShapeDtypeStruct((n, lpad, c2), y_dtype),           # bf16 by default
            jax.ShapeDtypeStruct((num_tiles, n, 8, cpad), jnp.float32),
        ],
        compiler_params=_COMPILER_PARAMS,
    )(x_nlc, halo, w_all)

    # ---- BN (training mode) folded into one per-channel scale/shift, applied
    # together with ReLU inside the final parity-interleave transpose (one fused
    # XLA op; the former second pallas pass is gone).
    count = jnp.float32(n * lout)
    tot = jnp.sum(stats, axis=(0, 1))                               # (8, cpad)
    ssum = tot[0, :c2].reshape(2, c_out).sum(axis=0)
    sqsum = tot[1, :c2].reshape(2, c_out).sum(axis=0)
    mean = ssum / count
    var = jnp.maximum(sqsum / count - mean * mean, 0.0)             # biased variance
    scale = gamma.astype(jnp.float32) * jax.lax.rsqrt(var + BN_EPS)
    shift = beta.astype(jnp.float32) - mean * scale
    scale2 = jnp.concatenate([scale, scale])                        # even|odd columns
    shift2 = jnp.concatenate([shift, shift])

    y = jnp.maximum(y_p[:, :l, :].astype(jnp.float32) * scale2 + shift2, 0.0)
    out = jnp.transpose(y.reshape(n, l, 2, c_out), (0, 3, 1, 2)).reshape(n, c_out, lout)
    return out


def _reference(x_ncl, weight, bias, gamma, beta):
    """Pure-JAX f32 reference of the same forward (for verification)."""
    x_up = jnp.repeat(x_ncl, 2, axis=2)
    y = jax.lax.conv_general_dilated(
        x_up, weight, window_strides=(1,), padding=((1, 1),),
        dimension_numbers=("NCH", "OIH", "NCH"))
    y = y + bias[None, :, None]
    mean = jnp.mean(y, axis=(0, 2), keepdims=True)
    var = jnp.mean((y - mean) ** 2, axis=(0, 2), keepdims=True)
    y = (y - mean) * jax.lax.rsqrt(var + BN_EPS)
    y = y * gamma[None, :, None] + beta[None, :, None]
    return jnp.maximum(y, 0.0)


if __name__ == "__main__":
    key = jax.random.PRNGKey(0)
    k_x, k_w, k_b = jax.random.split(key, 3)

    N, C_IN, C_OUT, L = 2, 4, 8, 16

    x = jax.random.normal(k_x, (N, C_IN, L), dtype=jnp.float32)
    # Conv1d params (deterministic synthetic init, PyTorch shapes).
    weight = jax.random.normal(k_w, (C_OUT, C_IN, 3), dtype=jnp.float32) * 0.1
    bias = jax.random.normal(k_b, (C_OUT,), dtype=jnp.float32) * 0.1
    # BatchNorm1d default init: weight=1, bias=0.
    gamma = jnp.ones((C_OUT,), jnp.float32)
    beta = jnp.zeros((C_OUT,), jnp.float32)

    ref = jax.block_until_ready(_reference(x, weight, bias, gamma, beta))

    # 1) Exact path: f32 MXU + f32 intermediate, 2 L-tiles (exercises the halo).
    out_f32 = jax.block_until_ready(
        up_conv_forward(x, weight, bias, gamma, beta,
                        tile_l=8, mxu_dtype=jnp.float32))
    assert out_f32.shape == (N, C_OUT, 2 * L), out_f32.shape
    assert jnp.allclose(out_f32, ref, rtol=1e-4, atol=1e-4), "f32 path mismatch"

    # 2) Default fast path: bf16 MXU feed + bf16 intermediate, auto tile (full L).
    out_bf16 = jax.block_until_ready(up_conv_forward(x, weight, bias, gamma, beta))
    assert out_bf16.shape == (N, C_OUT, 2 * L), out_bf16.shape
    assert jnp.allclose(out_bf16, ref, rtol=1e-1, atol=1e-1), "bf16 path mismatch"

    # 3) Ragged path: L=12 with tile_l=8 -> wrapper pads to 16 and masks BN stats.
    x12 = x[:, :, :12]
    ref12 = jax.block_until_ready(_reference(x12, weight, bias, gamma, beta))
    out12 = jax.block_until_ready(
        up_conv_forward(x12, weight, bias, gamma, beta,
                        tile_l=8, mxu_dtype=jnp.float32))
    assert out12.shape == (N, C_OUT, 24), out12.shape
    assert jnp.allclose(out12, ref12, rtol=1e-4, atol=1e-4), "ragged path mismatch"

    print("KERNEL_OK")
</pallas_src>

<mosaic_0001>
module attributes {stable_mosaic.version = 11 : i64} {
  func.func @_conv_stats_kernel(%arg0: i32, %arg1: i32, %arg2: memref<1x8x4xf32, #tpu.memory_space<vmem>>, %arg3: memref<1x1x2x4xf32, #tpu.memory_space<vmem>>, %arg4: memref<3x4x16xf32, #tpu.memory_space<vmem>>, %arg5: memref<1x8x16xf32, #tpu.memory_space<vmem>>, %arg6: memref<1x1x8x128xf32, #tpu.memory_space<vmem>>) attributes {dimension_semantics = [#tpu.dimension_semantics<parallel>, #tpu.dimension_semantics<parallel>], iteration_bounds = array<i64: 2, 2>, scalar_prefetch = 0 : i64, scratch_operands = 0 : i64, tpu.core_type = #tpu.core_type<tc>, window_params = [{transform_indices = @transform_0, window_bounds = array<i64: 1, 8, 4>}, {transform_indices = @transform_1, window_bounds = array<i64: 1, 1, 2, 4>}, {pipeline_mode = #tpu.pipeline_mode<synchronous>, transform_indices = @transform_2, window_bounds = array<i64: 3, 4, 16>}, {transform_indices = @transform_3, window_bounds = array<i64: 1, 8, 16>}, {transform_indices = @transform_4, window_bounds = array<i64: 1, 1, 8, 128>}]} {
    %c0 = arith.constant 0 : index
    %c0_0 = arith.constant 0 : index
    %c0_1 = arith.constant 0 : index
    %0 = vector.load %arg2[%c0, %c0_0, %c0_1] : memref<1x8x4xf32, #tpu.memory_space<vmem>>, vector<1x8x4xf32>
    %1 = vector.shape_cast %0 : vector<1x8x4xf32> to vector<8x4xf32>
    %c0_2 = arith.constant 0 : index
    %c0_3 = arith.constant 0 : index
    %c0_4 = arith.constant 0 : index
    %c0_5 = arith.constant 0 : index
    %2 = vector.load %arg3[%c0_2, %c0_3, %c0_4, %c0_5] : memref<1x1x2x4xf32, #tpu.memory_space<vmem>>, vector<1x1x2x4xf32>
    %3 = vector.shape_cast %2 : vector<1x1x2x4xf32> to vector<2x4xf32>
    %4 = vector.extract_strided_slice %3 {offsets = [0, 0], sizes = [1, 4], strides = [1, 1]} : vector<2x4xf32> to vector<1x4xf32>
    %5 = vector.extract_strided_slice %3 {offsets = [1, 0], sizes = [1, 4], strides = [1, 1]} : vector<2x4xf32> to vector<1x4xf32>
    %6 = tpu.concatenate %4, %1, %5 in 0 : vector<1x4xf32>, vector<8x4xf32>, vector<1x4xf32> -> vector<10x4xf32>
    %7 = vector.extract_strided_slice %6 {offsets = [0, 0], sizes = [8, 4], strides = [1, 1]} : vector<10x4xf32> to vector<8x4xf32>
    %c0_6 = arith.constant 0 : index
    %c0_7 = arith.constant 0 : index
    %c0_8 = arith.constant 0 : index
    %8 = vector.load %arg4[%c0_6, %c0_7, %c0_8] : memref<3x4x16xf32, #tpu.memory_space<vmem>>, vector<1x4x16xf32>
    %9 = vector.shape_cast %8 : vector<1x4x16xf32> to vector<4x16xf32>
    %cst = arith.constant dense<0.000000e+00> : vector<8x16xf32>
    %10 = tpu.matmul %7, %9, %cst {dimension_numbers = #tpu.dot_dimension_numbers<[1], [0], [0], [1], [0, 0, 1, 1], [], []>} : vector<8x4xf32>, vector<4x16xf32>, vector<8x16xf32> -> vector<8x16xf32>
    %11 = vector.extract_strided_slice %6 {offsets = [1, 0], sizes = [8, 4], strides = [1, 1]} : vector<10x4xf32> to vector<8x4xf32>
    %c1 = arith.constant 1 : index
    %c0_9 = arith.constant 0 : index
    %c0_10 = arith.constant 0 : index
    %12 = vector.load %arg4[%c1, %c0_9, %c0_10] : memref<3x4x16xf32, #tpu.memory_space<vmem>>, vector<1x4x16xf32>
    %13 = vector.shape_cast %12 : vector<1x4x16xf32> to vector<4x16xf32>
    %cst_11 = arith.constant dense<0.000000e+00> : vector<8x16xf32>
    %14 = tpu.matmul %11, %13, %cst_11 {dimension_numbers = #tpu.dot_dimension_numbers<[1], [0], [0], [1], [0, 0, 1, 1], [], []>} : vector<8x4xf32>, vector<4x16xf32>, vector<8x16xf32> -> vector<8x16xf32>
    %15 = arith.addf %10, %14 : vector<8x16xf32>
    %16 = vector.extract_strided_slice %6 {offsets = [2, 0], sizes = [8, 4], strides = [1, 1]} : vector<10x4xf32> to vector<8x4xf32>
    %c2 = arith.constant 2 : index
    %c0_12 = arith.constant 0 : index
    %c0_13 = arith.constant 0 : index
    %17 = vector.load %arg4[%c2, %c0_12, %c0_13] : memref<3x4x16xf32, #tpu.memory_space<vmem>>, vector<1x4x16xf32>
    %18 = vector.shape_cast %17 : vector<1x4x16xf32> to vector<4x16xf32>
    %cst_14 = arith.constant dense<0.000000e+00> : vector<8x16xf32>
    %19 = tpu.matmul %16, %18, %cst_14 {dimension_numbers = #tpu.dot_dimension_numbers<[1], [0], [0], [1], [0, 0, 1, 1], [], []>} : vector<8x4xf32>, vector<4x16xf32>, vector<8x16xf32> -> vector<8x16xf32>
    %20 = arith.addf %15, %19 : vector<8x16xf32>
    %c0_15 = arith.constant 0 : index
    %c0_16 = arith.constant 0 : index
    %c0_17 = arith.constant 0 : index
    %21 = vector.load %arg5[%c0_15, %c0_16, %c0_17] : memref<1x8x16xf32, #tpu.memory_space<vmem>>, vector<1x8x16xf32>
    %22 = vector.shape_cast %21 : vector<1x8x16xf32> to vector<8x16xf32>
    %23 = vector.shape_cast %20 : vector<8x16xf32> to vector<1x8x16xf32>
    tpu.vector_store %arg5[%c0_15, %c0_16, %c0_17], %23 {strides = array<i32>} : memref<1x8x16xf32, #tpu.memory_space<vmem>>, vector<1x8x16xf32>,
    %cst_18 = arith.constant dense<0.000000e+00> : vector<16xf32>
    %24 = vector.multi_reduction <add>, %20, %cst_18 [0] : vector<8x16xf32> to vector<16xf32>
    %25 = vector.shape_cast %24 : vector<16xf32> to vector<1x16xf32>
    %26 = arith.mulf %20, %20 : vector<8x16xf32>
    %cst_19 = arith.constant dense<0.000000e+00> : vector<16xf32>
    %27 = vector.multi_reduction <add>, %26, %cst_19 [0] : vector<8x16xf32> to vector<16xf32>
    %28 = vector.shape_cast %27 : vector<16xf32> to vector<1x16xf32>
    %cst_20 = arith.constant 0.000000e+00 : f32
    %29 = vector.broadcast %cst_20 : f32 to vector<6x16xf32>
    %30 = tpu.concatenate %25, %28, %29 in 0 : vector<1x16xf32>, vector<1x16xf32>, vector<6x16xf32> -> vector<8x16xf32>
    %cst_21 = arith.constant 0.000000e+00 : f32
    %31 = vector.broadcast %cst_21 : f32 to vector<8x112xf32>
    %32 = tpu.concatenate %30, %31 in 1 : vector<8x16xf32>, vector<8x112xf32> -> vector<8x128xf32>
    %c0_22 = arith.constant 0 : index
    %c0_23 = arith.constant 0 : index
    %c0_24 = arith.constant 0 : index
    %c0_25 = arith.constant 0 : index
    %33 = vector.load %arg6[%c0_22, %c0_23, %c0_24, %c0_25] : memref<1x1x8x128xf32, #tpu.memory_space<vmem>>, vector<1x1x8x128xf32>
    %34 = vector.shape_cast %33 : vector<1x1x8x128xf32> to vector<8x128xf32>
    %35 = vector.shape_cast %32 : vector<8x128xf32> to vector<1x1x8x128xf32>
    tpu.vector_store %arg6[%c0_22, %c0_23, %c0_24, %c0_25], %35 {strides = array<i32>} : memref<1x1x8x128xf32, #tpu.memory_space<vmem>>, vector<1x1x8x128xf32>,
    return
  }
  func.func @transform_0(%arg0: i32, %arg1: i32) -> (i32, i32, i32) {
    %c0_i32 = arith.constant 0 : i32
    %c0_i32_0 = arith.constant 0 : i32
    return %arg1, %arg0, %c0_i32 : i32, i32, i32
  }
  func.func @transform_1(%arg0: i32, %arg1: i32) -> (i32, i32, i32, i32) {
    %c0_i32 = arith.constant 0 : i32
    %c0_i32_0 = arith.constant 0 : i32
    %c0_i32_1 = arith.constant 0 : i32
    return %arg0, %arg1, %c0_i32, %c0_i32_0 : i32, i32, i32, i32
  }
  func.func @transform_2(%arg0: i32, %arg1: i32) -> (i32, i32, i32) {
    %c0_i32 = arith.constant 0 : i32
    %c0_i32_0 = arith.constant 0 : i32
    %c0_i32_1 = arith.constant 0 : i32
    %c0_i32_2 = arith.constant 0 : i32
    return %c0_i32, %c0_i32_0, %c0_i32_1 : i32, i32, i32
  }
  func.func @transform_3(%arg0: i32, %arg1: i32) -> (i32, i32, i32) {
    %c0_i32 = arith.constant 0 : i32
    %c0_i32_0 = arith.constant 0 : i32
    return %arg1, %arg0, %c0_i32 : i32, i32, i32
  }
  func.func @transform_4(%arg0: i32, %arg1: i32) -> (i32, i32, i32, i32) {
    %c0_i32 = arith.constant 0 : i32
    %c0_i32_0 = arith.constant 0 : i32
    %c0_i32_1 = arith.constant 0 : i32
    return %arg0, %arg1, %c0_i32, %c0_i32_0 : i32, i32, i32, i32
  }
}

</mosaic_0001>

<bundles_post_ra>
// kernel: squeeze.12
= control target key start
LH: loop header
LB: loop body
LE: loop exit
PB: predicated region body
PF: predicated region fallthrough
CT: control target
= control target key end

     0   :  { %vm8_vm0 = vcmask 64512   ;;  %s42_s0 = inlined_call_operand.vmem [shape: f32[16], index: 0, kind: input, shape index: {}]   ;;  %s43_s1 = inlined_call_operand.vmem [shape: f32[2,8], index: 1, kind: output, shape index: {}]  }
   0x1   :  { %v5_v0 = vld [vmem:[%s42_s0] sm:$0x1]  ;;  %s25_s0 = smov 120  }
   0x2   :  { %6 = vst [vmem:[#allocation1] sm:$0x1] %v5_v0 }
   0x9   :  { %v10_v1 = vld [vmem:[#allocation1] sm:$0x1]  }
   0xa   :  { %v7_v2 = vld [vmem:[#allocation1] sm:$0x1]   ;;  %11 = vrot.lane.b32.xlu0 %v10_v1, %s25_s0 }
   0xb   :  { %9 = vst.msk [vmem:[#allocation0] sm:$0x1] %vm8_vm0, %v7_v2  }
  0x7c   :  { %v12_v3 = vpop.permute.xlu0 %11  }
  0x7d   :  { %15 = vst.msk [vmem:[#allocation0 + $0x1] sm:$0x1] %vm8_vm0, %v12_v3  }
  0x84   :  { %v20_v4 = vld [vmem:[#allocation0] sm:$0x3] }
  0x85   :  { %23 = vst [vmem:[%s43_s1] sm:$0x3] %v20_v4 }

// kernel: up_conv_forward.1
= control target key start
LH: loop header
LB: loop body
LE: loop exit
PB: predicated region body
PF: predicated region fallthrough
CT: control target
= control target key end

     0   :  { %s858_s15 = smov 0   ;;  %s860_s16 = smov 0   ;;  %s951_s0 = inlined_call_operand.vmem [shape: f32[2,16,4], index: 0, kind: input, shape index: {}]   ;;  %s952_s1 = inlined_call_operand.vmem [shape: f32[2,2,2,4], index: 1, kind: input, shape index: {}]   ;;  %s953_s2 = inlined_call_operand.vmem [shape: f32[3,4,16], index: 2, kind: input, shape index: {}]   ;;  %s954_s3 = inlined_call_operand.vmem [shape: f32[2,16,16], index: 3, kind: output, shape index: {0}]   ;;  %s955_s4 = inlined_call_operand.vmem [shape: f32[2,2,8,128], index: 4, kind: output, shape index: {1}]  }
   0x1   :  { %s862_s17 = smov 0   ;;  %s864_s18 = smov 0  }
   0x2   :  { %s866_s19 = smov 0  }
   0x3 LB: > { %s24_s20 = sadd.s32 1, %s821_s17  ;;  %s27_s21 = sadd.s32 1, %s825_s18  ;;  %s829_s19 = sphi %s866_s19, %s15_s19   ;;  %s825_s18 = sphi %s864_s18, %s959_s18   ;;  %s821_s17 = sphi %s862_s17, %s958_s17   ;;  %s817_s16 = sphi %s860_s16, %s957_s16   ;;  %s813_s15 = sphi %s858_s15, %s956_s15  }
   0x4   : > { %p25_p0 = scmp.ge.s32.totalorder %s24_s20, 2  ;;  %p709_p1 = scmp.ge.s32.totalorder %s829_s19, 1 }
   0x5   : > { %p201_p2 = scmp.lt.s32.totalorder %s829_s19, 5 }
   0x6   : > { %s961_s20 = smov (%p25_p0, %s24_s20), 0  ;;  %s963_s21 = smov (!%p25_p0, %s27_s21), %s825_s18 }
   0x7   : > { %p202_p3 = pnand %p709_p1, %p201_p2  ;;  %p29_p4 = scmp.ge.s32.totalorder %s963_s21, 2 }
   0x8   : > { %p249_p5 = scmp.lt.s32.totalorder (!%p202_p3), %s813_s15, 1  ;;  %p251_p6 = scmp.lt.s32.totalorder (!%p202_p3), %s817_s16, 1 }
   0x9   : > { %s965_s21 = smov (%p29_p4, %s963_s21), 0  ;;  %205 = sbr.rel (%p202_p3) target bundleno = 245 (0xf5), region = 32 }
   0xe   : > { %v718_v0 = vld [vmem:[%s953_s2 + $0x4] sm:$0xf]  ;;  %vm301_vm0 = vcmask 1043456   ;;  %v831_v1 = vmov 0.0   ;;  %v289_v2 = vld [vmem:[%s953_s2] sm:$0xf] }
   0xf   : > { %734 = vmatprep.subr.mxu0 %v831_v1  ;;  %739 = vmatprep.subr.mxu1 %v831_v1  ;;  %vm832_vm1 = vmmov 0   ;;  %s967_s15 = smov (!%p249_p5, %s813_s15), 1  ;;  %s969_s16 = smov (!%p251_p6, %s817_s16), 1  ;;  %vm286_vm2 = vcmask 1040384   ;;  %vm298_vm3 = vcmask 31744   ;;  %vm294_vm4 = vcmask 1046528  }
  0x10   : > { %735 = vmatpush3.msk.msra.mxu0 %vm301_vm0, %v718_v0  ;;  %736 = vmatprep.mubr.msk.f32.mxu0 %vm832_vm1, %v831_v1  ;;  %s710_s26 = sshll.u32 %s967_s15, 1  ;;  %s712_s28 = sshll.u32 %s969_s16, 1  ;;  %v723_v12 = vld [vmem:[%s953_s2 + $0x8] sm:$0xf]  ;;  %vm452_vm5 = vcmask 1045504   ;;  %vm532_vm6 = vcmask 130048  }
  0x11   : > { %740 = vmatpush3.msk.msra.mxu1 %vm301_vm0, %v289_v2  ;;  %741 = vmatprep.mubr.msk.f32.mxu1 %vm832_vm1, %v831_v1  ;;  %s898_s27 = sadd.s32 %s710_s26, %s969_s16  ;;  %s901_s30 = sadd.s32 %s712_s28, %s967_s15  ;;  %vm550_vm7 = vcmask 1041408  }
  0x12   : > { %744 = vmatprep.subr.mxu0 %v831_v1  ;;  %s711_s29 = sshll.u32 %s898_s27, 3  ;;  %s713_s8 = sshll.u32 %s901_s30, 1 }
  0x13   : > { %s256_s7 = scalar_lea.vmem %s951_s0, %s711_s29  ;;  %s264_s11 = scalar_lea.vmem %s952_s1, %s713_s8 }
  0x14   : > { %v281_v3 = vld [vmem:[%s256_s7] sm:$0xff]  ;;  %s272_s16 = scalar_lea.vmem %s954_s3, %s711_s29  ;;  %s717_s22 = sshll.u32 %s901_s30, 3 }
  0x15   : > { %v282_v4 = vld [vmem:[%s264_s11] sm:$0x3]  ;;  %v284_v5 = vrot.slane %v281_v3, 7  ;;  %s280_s25 = scalar_lea.vmem %s955_s4, %s717_s22 }
  0x17   : > { %v287_v6 = vsel %vm286_vm2, %v282_v4, %v284_v5  ;;  %v288_v7 = vsel %vm286_vm2, %v284_v5, %v282_v4 }
  0x18   : > { %v295_v8 = vrot.slane %v287_v6, 1  ;;  %v296_v9 = vrot.slane %v288_v7, 1  ;;  %v454_v10 = vrot.slane %v288_v7, 2  ;;  %742 = vmatmul.mubr.msk.f32.vlgmr.msra.gmra.mxu1 %vm298_vm3, %v287_v6  ;;  %v453_v11 = vrot.slane %v287_v6, 2 }
  0x1a   : > { %v297_v13 = vsel %vm294_vm4, %v295_v8, %v296_v9  ;;  %v455_v14 = vsel %vm452_vm5, %v453_v11, %v454_v10 }
  0x1b   : > { %737 = vmatmul.mubr.msk.f32.vlgmr.msra.gmra.mxu0 %vm298_vm3, %v297_v13 }
  0x1c   : > { %745 = vmatpush3.msk.msra.mxu0 %vm301_vm0, %v723_v12  ;;  %746 = vmatprep.mubr.msk.f32.mxu0 %vm832_vm1, %v831_v1 }
  0x1f   : > { %747 = vmatmul.mubr.msk.f32.vlgmr.msra.gmra.mxu0 %vm298_vm3, %v455_v14 }
  0xd8   : > { %v446_v15 = vpop.f32.mrf.mxu1 }
  0xda   : > { %v743_v16 = vpop.f32.mrf.mxu1 }
  0xdb   : > { %v371_v17 = vpop.f32.mrf.mxu0 }
  0xdc   : > { %v447_v19 = vadd.f32 %v446_v15, %v371_v17 }
  0xdd   : > { %v738_v18 = vpop.f32.mrf.mxu0 }
  0xdf   : > { %v527_v20 = vpop.f32.mrf.mxu0 }
  0xe0   : > { %v531_v21 = vadd.f32 %v527_v20, %v447_v19 }
  0xe1   : > { %v748_v22 = vpop.f32.mrf.mxu0 }
  0xe2   : > { %533 = vst.msk [vmem:[%s272_s16] sm:$0xff] %vm532_vm6, %v531_v21  ;;  %v534_v23 = vsel %vm532_vm6, %v531_v21, 0.0  ;;  %v541_v24 = vmul.f32 %v531_v21, %v531_v21 }
  0xe3   : > { %v535_v25 = vrot.slane %v534_v23, 4 }
  0xe4   : > { %v542_v26 = vsel %vm532_vm6, %v541_v24, 0.0 }
  0xe5   : > { %v536_v27 = vadd.f32 %v535_v25, %v534_v23  ;;  %v543_v28 = vrot.slane %v542_v26, 4 }
  0xe7   : > { %v537_v29 = vrot.slane %v536_v27, 2  ;;  %v544_v30 = vadd.f32 %v543_v28, %v542_v26 }
  0xe9   : > { %v538_v31 = vadd.f32 %v537_v29, %v536_v27  ;;  %v545_v32 = vrot.slane %v544_v30, 2 }
  0xeb   : > { %v539_v33 = vrot.slane %v538_v31, 1  ;;  %v546_v34 = vadd.f32 %v545_v32, %v544_v30 }
  0xed   : > { %v547_v35 = vrot.slane %v546_v34, 1  ;;  %v540_v36 = vadd.f32 %v539_v33, %v538_v31 }
  0xef   : > { %v548_v37 = vadd.f32 %v547_v35, %v546_v34 }
  0xf1   : > { %v549_v38 = vsel %vm286_vm2, %v540_v36, %v548_v37 }
  0xf2   : > { %v551_v39 = vsel %vm550_vm7, %v549_v38, 0.0 }
  0xf3   : > { %v552_v40 = vsel %vm532_vm6, %v551_v39, 0.0 }
  0xf4   : > { %553 = vst [vmem:[%s280_s25] sm:$0xff] %v552_v40 }
  0xf5 PF: > { %s15_s19 = sadd.s32 1, %s829_s19   ;;  %s956_s15 = smov %s821_s17 }
  0xf6   : > { %p12_p7 = scmp.ge.s32.totalorder %s15_s19, 6   ;;  %s957_s16 = smov %s825_s18 }
  0xf7   : > { %s958_s17 = smov %s961_s20  ;;  %s959_s18 = smov %s965_s21 }
  0xf8   :  { %14 = sbr.rel (!%p12_p7) target bundleno = 3 (0x3), region = 79 }

</bundles_post_ra>
